<compile_context>
chip_gen: v5e
topology: v5e:2x2
jax: 0.10.0
libtpu: 0.0.40
codegen_flags: <defaults>
</compile_context>

<pallas_src>
import functools

import jax
import jax.numpy as jnp
from jax.experimental import pallas as pl
from jax.experimental.pallas import tpu as pltpu


def _attention_kernel(x_ref, ctx_ref, w_ref):
    # x_ref: (TB, S, Hp) block of lstm_output
    x = x_ref[...].astype(jnp.float32)

    # Numerically stable softmax over the seq axis (dim=1), per hidden channel.
    m = jnp.max(x, axis=1, keepdims=True)             # (TB, 1, Hp)
    e = jnp.exp(x - m)                                 # (TB, S, Hp)  (EUP)
    denom = jnp.sum(e, axis=1, keepdims=True)          # (TB, 1, Hp)
    recip = pl.reciprocal(denom, approx=True)          # (TB, 1, Hp)  EUP vrcp

    # Attention weights: single full-tile multiply on the normalized path.
    w_ref[...] = (e * recip).astype(w_ref.dtype)       # (TB, S, Hp)

    # Fused weighted sum: sum(softmax(x) * x) == recip * sum(e * x).
    s = jnp.sum(e * x, axis=1)                         # (TB, Hp)
    ctx = s * recip[:, 0, :]                           # (TB, Hp) lane/sublane-dense
    ctx_ref[...] = ctx.astype(ctx_ref.dtype)


def _round_up(x, m):
    return ((x + m - 1) // m) * m


def _choose_tb(B, S, Hp, in_bytes, w_bytes, budget_bytes=8 * 1024 * 1024):
    # Per batch row per step: input tile + weights tile (+ tiny ctx row), x2 for
    # double buffering.  ~8 MiB keeps us well under the default scoped VMEM on
    # v5e (16 MiB), v6e (32 MiB) and v7x (32 MiB scoped of 64 MiB physical).
    per_row = S * Hp * (in_bytes + w_bytes) + Hp * in_bytes
    tb = max(1, budget_bytes // (2 * per_row))
    tb = max(8, (tb // 8) * 8)            # multiple of 8 -> dense sublane stores
    cap = _round_up(B, 8)                 # don't over-allocate past (padded) batch
    return min(tb, cap)


@jax.jit
def attention_layer(lstm_output):
    """Returns (context_vector (B, H), attention_weights (B, S, H))."""
    B, S, H = lstm_output.shape
    dtype = lstm_output.dtype

    # Pad hidden to a full 128-lane multiple and batch to a multiple of TB.
    Hp = _round_up(H, 128)
    in_bytes = jnp.dtype(dtype).itemsize
    TB = _choose_tb(B, S, Hp, in_bytes, in_bytes)
    Bp = _round_up(B, TB)

    x = lstm_output
    if Bp != B or Hp != H:
        x = jnp.pad(x, ((0, Bp - B), (0, 0), (0, Hp - H)))

    grid = (Bp // TB,)

    ctx_p, w_p = pl.pallas_call(
        _attention_kernel,
        out_shape=(
            jax.ShapeDtypeStruct((Bp, Hp), dtype),      # context, lane-dense (B, H)
            jax.ShapeDtypeStruct((Bp, S, Hp), dtype),   # attention weights
        ),
        grid=grid,
        in_specs=[pl.BlockSpec((TB, S, Hp), lambda b: (b, 0, 0))],
        out_specs=(
            pl.BlockSpec((TB, Hp), lambda b: (b, 0)),
            pl.BlockSpec((TB, S, Hp), lambda b: (b, 0, 0)),
        ),
        compiler_params=pltpu.CompilerParams(
            dimension_semantics=("parallel",),
            vmem_limit_bytes=32 * 1024 * 1024,
        ),
    )(x)

    context_vector = ctx_p[:B, :H]          # (B, H)
    attention_weights = w_p[:B, :, :H]      # (B, S, H)
    return context_vector, attention_weights


def _reference(lstm_output):
    xf = lstm_output.astype(jnp.float32)
    w = jax.nn.softmax(xf, axis=1)
    ctx = jnp.sum(w * xf, axis=1)
    return ctx, w


if __name__ == "__main__":
    key = jax.random.PRNGKey(0)
    B, S, H = 2, 8, 32  # batch, seq, hidden
    lstm_output = jax.random.normal(key, (B, S, H), dtype=jnp.float32)

    ctx, w = attention_layer(lstm_output)
    ctx = jax.block_until_ready(ctx)
    w = jax.block_until_ready(w)

    ctx_ref, w_ref = _reference(lstm_output)
    assert ctx.shape == (B, H), ctx.shape
    assert w.shape == (B, S, H), w.shape
    # Tolerances account for the approximate (EUP) reciprocal in the softmax denom.
    assert jnp.allclose(ctx, ctx_ref, atol=5e-3, rtol=5e-3)
    assert jnp.allclose(w, w_ref, atol=5e-3, rtol=5e-3)

    print("KERNEL_OK")
</pallas_src>

<mosaic_0001>
module attributes {stable_mosaic.version = 11 : i64} {
  func.func @_attention_kernel(%arg0: i32, %arg1: memref<8x8x128xf32, #tpu.memory_space<vmem>>, %arg2: memref<8x128xf32, #tpu.memory_space<vmem>>, %arg3: memref<8x8x128xf32, #tpu.memory_space<vmem>>) attributes {dimension_semantics = [#tpu.dimension_semantics<parallel>], iteration_bounds = array<i64: 1>, scalar_prefetch = 0 : i64, scratch_operands = 0 : i64, tpu.core_type = #tpu.core_type<tc>, window_params = [{transform_indices = @transform_0, window_bounds = array<i64: 8, 8, 128>}, {transform_indices = @transform_1, window_bounds = array<i64: 8, 128>}, {transform_indices = @transform_2, window_bounds = array<i64: 8, 8, 128>}]} {
    %c0 = arith.constant 0 : index
    %c0_0 = arith.constant 0 : index
    %c0_1 = arith.constant 0 : index
    %0 = vector.load %arg1[%c0, %c0_0, %c0_1] : memref<8x8x128xf32, #tpu.memory_space<vmem>>, vector<8x8x128xf32>
    %cst = arith.constant dense<0xFF800000> : vector<8x128xf32>
    %1 = vector.multi_reduction <maximumf>, %0, %cst [1] : vector<8x8x128xf32> to vector<8x128xf32>
    %2 = vector.shape_cast %1 : vector<8x128xf32> to vector<8x1x128xf32>
    %3 = vector.broadcast %2 : vector<8x1x128xf32> to vector<8x8x128xf32>
    %4 = arith.subf %0, %3 : vector<8x8x128xf32>
    %5 = math.exp %4 : vector<8x8x128xf32>
    %cst_2 = arith.constant dense<0.000000e+00> : vector<8x128xf32>
    %6 = vector.multi_reduction <add>, %5, %cst_2 [1] : vector<8x8x128xf32> to vector<8x128xf32>
    %7 = vector.shape_cast %6 : vector<8x128xf32> to vector<8x1x128xf32>
    %8 = tpu.reciprocal %7 {approx = true} : vector<8x1x128xf32> -> vector<8x1x128xf32>
    %9 = vector.broadcast %8 : vector<8x1x128xf32> to vector<8x8x128xf32>
    %10 = arith.mulf %5, %9 : vector<8x8x128xf32>
    %c0_3 = arith.constant 0 : index
    %c0_4 = arith.constant 0 : index
    %c0_5 = arith.constant 0 : index
    %11 = vector.load %arg3[%c0_3, %c0_4, %c0_5] : memref<8x8x128xf32, #tpu.memory_space<vmem>>, vector<8x8x128xf32>
    tpu.vector_store %arg3[%c0_3, %c0_4, %c0_5], %10 {strides = array<i32>} : memref<8x8x128xf32, #tpu.memory_space<vmem>>, vector<8x8x128xf32>,
    %12 = arith.mulf %5, %0 : vector<8x8x128xf32>
    %cst_6 = arith.constant dense<0.000000e+00> : vector<8x128xf32>
    %13 = vector.multi_reduction <add>, %12, %cst_6 [1] : vector<8x8x128xf32> to vector<8x128xf32>
    %14 = vector.shape_cast %8 : vector<8x1x128xf32> to vector<8x128xf32>
    %15 = arith.mulf %13, %14 : vector<8x128xf32>
    %c0_7 = arith.constant 0 : index
    %c0_8 = arith.constant 0 : index
    %16 = vector.load %arg2[%c0_7, %c0_8] : memref<8x128xf32, #tpu.memory_space<vmem>>, vector<8x128xf32>
    tpu.vector_store %arg2[%c0_7, %c0_8], %15 {strides = array<i32>} : memref<8x128xf32, #tpu.memory_space<vmem>>, vector<8x128xf32>,
    return
  }
  func.func @transform_0(%arg0: i32) -> (i32, i32, i32) {
    %c0_i32 = arith.constant 0 : i32
    %c0_i32_0 = arith.constant 0 : i32
    %c0_i32_1 = arith.constant 0 : i32
    return %arg0, %c0_i32, %c0_i32_0 : i32, i32, i32
  }
  func.func @transform_1(%arg0: i32) -> (i32, i32) {
    %c0_i32 = arith.constant 0 : i32
    %c0_i32_0 = arith.constant 0 : i32
    return %arg0, %c0_i32 : i32, i32
  }
  func.func @transform_2(%arg0: i32) -> (i32, i32, i32) {
    %c0_i32 = arith.constant 0 : i32
    %c0_i32_0 = arith.constant 0 : i32
    %c0_i32_1 = arith.constant 0 : i32
    return %arg0, %c0_i32, %c0_i32_0 : i32, i32, i32
  }
}

</mosaic_0001>

<bundles_post_ra>
// kernel: attention_layer.1
= control target key start
LH: loop header
LB: loop body
LE: loop exit
PB: predicated region body
PF: predicated region fallthrough
CT: control target
= control target key end

     0   :  { %vm234_vm0 = vcmask 1041409   ;;  %vm236_vm1 = vcmask 1042434   ;;  %vm238_vm2 = vcmask 1043459   ;;  %vm240_vm3 = vcmask 1044484   ;;  %s457_s0 = inlined_call_operand.vmem [shape: f32[8,8,128], index: 0, kind: input, shape index: {}]   ;;  %s458_s2 = inlined_call_operand.vmem [shape: f32[8,8,128], index: 2, kind: output, shape index: {1}]   ;;  %s459_s1 = inlined_call_operand.vmem [shape: f32[8,128], index: 1, kind: output, shape index: {0}]  }
   0x1   :  { %v308_v0 = vld [vmem:[%s457_s0] sm:$0xff]  ;;  %v313_v1 = vld [vmem:[%s457_s0 + $0x8] sm:$0xff]  ;;  %v318_v2 = vld [vmem:[%s457_s0 + $0x10] sm:$0xff]  ;;  %vm242_vm4 = vcmask 1045509   ;;  %vm244_vm5 = vcmask 1046534   ;;  %vm246_vm6 = vcmask 1047559  }
   0x2   :  { %v18_v3 = vrot.slane %v308_v0, 4  ;;  %v24_v4 = vrot.slane %v313_v1, 4  ;;  %v30_v5 = vrot.slane %v318_v2, 4  ;;  %v326_v6 = vld [vmem:[%s457_s0 + $0x18] sm:$0xff]  ;;  %v331_v7 = vld [vmem:[%s457_s0 + $0x20] sm:$0xff]  ;;  %v336_v8 = vld [vmem:[%s457_s0 + $0x28] sm:$0xff] }
   0x3   :  { %v36_v9 = vrot.slane %v326_v6, 4  ;;  %v42_v10 = vrot.slane %v331_v7, 4  ;;  %v48_v11 = vrot.slane %v336_v8, 4  ;;  %v344_v12 = vld [vmem:[%s457_s0 + $0x30] sm:$0xff]  ;;  %v349_v13 = vld [vmem:[%s457_s0 + $0x38] sm:$0xff] }
   0x4   :  { %v19_v14 = vmax.f32 %v308_v0, %v18_v3  ;;  %v25_v15 = vmax.f32 %v313_v1, %v24_v4  ;;  %v31_v16 = vmax.f32 %v318_v2, %v30_v5  ;;  %v54_v17 = vrot.slane %v344_v12, 4 }
   0x5   :  { %v37_v18 = vmax.f32 %v326_v6, %v36_v9  ;;  %v43_v19 = vmax.f32 %v331_v7, %v42_v10  ;;  %v49_v20 = vmax.f32 %v336_v8, %v48_v11  ;;  %v60_v21 = vrot.slane %v349_v13, 4 }
   0x6   :  { %v20_v22 = vrot.slane %v19_v14, 2  ;;  %v26_v23 = vrot.slane %v25_v15, 2  ;;  %v32_v24 = vrot.slane %v31_v16, 2  ;;  %v55_v25 = vmax.f32 %v344_v12, %v54_v17 }
   0x7   :  { %v38_v26 = vrot.slane %v37_v18, 2  ;;  %v44_v27 = vrot.slane %v43_v19, 2  ;;  %v50_v28 = vrot.slane %v49_v20, 2  ;;  %v61_v29 = vmax.f32 %v349_v13, %v60_v21 }
   0x8   :  { %v21_v30 = vmax.f32 %v19_v14, %v20_v22  ;;  %v27_v31 = vmax.f32 %v25_v15, %v26_v23  ;;  %v33_v32 = vmax.f32 %v31_v16, %v32_v24  ;;  %v56_v33 = vrot.slane %v55_v25, 2 }
   0x9   :  { %v39_v34 = vmax.f32 %v37_v18, %v38_v26  ;;  %v45_v35 = vmax.f32 %v43_v19, %v44_v27  ;;  %v51_v36 = vmax.f32 %v49_v20, %v50_v28  ;;  %v62_v37 = vrot.slane %v61_v29, 2 }
   0xa   :  { %v22_v38 = vrot.slane %v21_v30, 1  ;;  %v28_v39 = vrot.slane %v27_v31, 1  ;;  %v34_v40 = vrot.slane %v33_v32, 1  ;;  %v57_v41 = vmax.f32 %v55_v25, %v56_v33 }
   0xb   :  { %v40_v42 = vrot.slane %v39_v34, 1  ;;  %v46_v43 = vrot.slane %v45_v35, 1  ;;  %v52_v44 = vrot.slane %v51_v36, 1  ;;  %v63_v45 = vmax.f32 %v61_v29, %v62_v37 }
   0xc   :  { %v23_v46 = vmax.f32 %v21_v30, %v22_v38  ;;  %v29_v47 = vmax.f32 %v27_v31, %v28_v39  ;;  %v35_v48 = vmax.f32 %v33_v32, %v34_v40  ;;  %v58_v49 = vrot.slane %v57_v41, 1 }
   0xd   :  { %v41_v50 = vmax.f32 %v39_v34, %v40_v42  ;;  %v47_v51 = vmax.f32 %v45_v35, %v46_v43  ;;  %v53_v52 = vmax.f32 %v51_v36, %v52_v44  ;;  %v64_v53 = vrot.slane %v63_v45, 1 }
   0xe   :  { %v66_v54 = vsub.f32 %v308_v0, %v23_v46  ;;  %v67_v55 = vsub.f32 %v313_v1, %v29_v47  ;;  %v68_v56 = vsub.f32 %v318_v2, %v35_v48  ;;  %v59_v57 = vmax.f32 %v57_v41, %v58_v49 }
   0xf   :  { %v69_v58 = vsub.f32 %v326_v6, %v41_v50  ;;  %v70_v59 = vsub.f32 %v331_v7, %v47_v51  ;;  %v65_v60 = vmax.f32 %v63_v45, %v64_v53  ;;  %v71_v3 = vsub.f32 %v336_v8, %v53_v52 }
  0x10   :  { %v74_v61 = vmul.f32 1.442695, %v66_v54  ;;  %v76_v62 = vmul.f32 1.442695, %v67_v55  ;;  %v78_v63 = vmul.f32 1.442695, %v68_v56  ;;  %v72_v5 = vsub.f32 %v344_v12, %v59_v57 }
  0x11   :  { %v80_v4 = vmul.f32 1.442695, %v69_v58  ;;  %v82_v9 = vmul.f32 1.442695, %v70_v59  ;;  %v73_v10 = vsub.f32 %v349_v13, %v65_v60  ;;  %v84_v11 = vmul.f32 1.442695, %v71_v3 }
  0x12   :  { %258 = vpow2.f32 %v74_v61  ;;  %v86_v14 = vmul.f32 1.442695, %v72_v5 }
  0x13   :  { %260 = vpow2.f32 %v76_v62  ;;  %v88_v15 = vmul.f32 1.442695, %v73_v10 }
  0x14   :  { %262 = vpow2.f32 %v78_v63 }
  0x15   :  { %264 = vpow2.f32 %v80_v4 }
  0x16   :  { %266 = vpow2.f32 %v82_v9 }
  0x17   :  { %268 = vpow2.f32 %v84_v11 }
  0x18   :  { %v369_v16 = vpop.eup %258  ;;  %270 = vpow2.f32 %v86_v14 }
  0x19   :  { %v371_v17 = vpop.eup %260  ;;  %v90_v18 = vrot.slane %v369_v16, 4  ;;  %v162_v19 = vmul.f32 %v369_v16, %v308_v0  ;;  %272 = vpow2.f32 %v88_v15 }
  0x1a   :  { %v376_v20 = vpop.eup %262  ;;  %v96_v21 = vrot.slane %v371_v17, 4  ;;  %v163_v22 = vmul.f32 %v371_v17, %v313_v1 }
  0x1b   :  { %v381_v23 = vpop.eup %264  ;;  %v91_v24 = vadd.f32 %v369_v16, %v90_v18  ;;  %v170_v25 = vrot.slane %v162_v19, 4  ;;  %v102_v26 = vrot.slane %v376_v20, 4  ;;  %v164_v27 = vmul.f32 %v376_v20, %v318_v2 }
  0x1c   :  { %v387_v0 = vpop.eup %266  ;;  %v97_v28 = vadd.f32 %v371_v17, %v96_v21  ;;  %v176_v29 = vrot.slane %v163_v22, 4  ;;  %v108_v30 = vrot.slane %v381_v23, 4  ;;  %v393_v1 = vmul.f32 %v381_v23, %v326_v6 }
  0x1d   :  { %v92_v31 = vrot.slane %v91_v24, 2  ;;  %v171_v32 = vadd.f32 %v170_v25, %v162_v19  ;;  %v103_v33 = vadd.f32 %v376_v20, %v102_v26  ;;  %v182_v34 = vrot.slane %v164_v27, 4  ;;  %v396_v35 = vpop.eup %268 }
  0x1e   :  { %v98_v36 = vrot.slane %v97_v28, 2  ;;  %v177_v2 = vadd.f32 %v176_v29, %v163_v22  ;;  %v109_v37 = vadd.f32 %v381_v23, %v108_v30  ;;  %v114_v38 = vrot.slane %v387_v0, 4  ;;  %v400_v39 = vpop.eup %270 }
  0x1f   :  { %v93_v40 = vadd.f32 %v92_v31, %v91_v24  ;;  %v172_v41 = vrot.slane %v171_v32, 2  ;;  %v104_v42 = vrot.slane %v103_v33, 2  ;;  %v183_v6 = vadd.f32 %v182_v34, %v164_v27  ;;  %v402_v43 = vpop.eup %272 }
  0x20   :  { %v99_v44 = vadd.f32 %v98_v36, %v97_v28  ;;  %v178_v45 = vrot.slane %v177_v2, 2  ;;  %v110_v46 = vrot.slane %v109_v37, 2  ;;  %v115_v47 = vadd.f32 %v387_v0, %v114_v38 }
  0x21   :  { %v94_v48 = vrot.slane %v93_v40, 1  ;;  %v173_v49 = vadd.f32 %v172_v41, %v171_v32  ;;  %v105_v50 = vadd.f32 %v104_v42, %v103_v33  ;;  %v184_v51 = vrot.slane %v183_v6, 2 }
  0x22   :  { %v100_v52 = vrot.slane %v99_v44, 1  ;;  %v179_v53 = vadd.f32 %v178_v45, %v177_v2  ;;  %v111_v54 = vadd.f32 %v110_v46, %v109_v37  ;;  %v116_v55 = vrot.slane %v115_v47, 2 }
  0x23   :  { %v95_v56 = vadd.f32 %v94_v48, %v93_v40  ;;  %v174_v57 = vrot.slane %v173_v49, 1  ;;  %v106_v58 = vrot.slane %v105_v50, 1  ;;  %v185_v59 = vadd.f32 %v184_v51, %v183_v6 }
  0x24   :  { %v101_v60 = vadd.f32 %v100_v52, %v99_v44  ;;  %v180_v61 = vrot.slane %v179_v53, 1  ;;  %v112_v62 = vrot.slane %v111_v54, 1  ;;  %v117_v63 = vadd.f32 %v116_v55, %v115_v47 }
  0x25   :  { %274 = vrcp.f32 %v95_v56  ;;  %v175_v3 = vadd.f32 %v174_v57, %v173_v49  ;;  %v107_v4 = vadd.f32 %v106_v58, %v105_v50  ;;  %v186_v5 = vrot.slane %v185_v59, 1 }
  0x26   :  { %276 = vrcp.f32 %v101_v60  ;;  %v181_v9 = vadd.f32 %v180_v61, %v179_v53  ;;  %v113_v10 = vadd.f32 %v112_v62, %v111_v54  ;;  %v118_v11 = vrot.slane %v117_v63, 1 }
  0x27   :  { %278 = vrcp.f32 %v107_v4  ;;  %v187_v14 = vadd.f32 %v186_v5, %v185_v59  ;;  %v120_v15 = vrot.slane %v396_v35, 4  ;;  %v126_v18 = vrot.slane %v400_v39, 4 }
  0x28   :  { %280 = vrcp.f32 %v113_v10  ;;  %v119_v19 = vadd.f32 %v118_v11, %v117_v63  ;;  %v132_v21 = vrot.slane %v402_v43, 4  ;;  %v166_v22 = vmul.f32 %v387_v0, %v331_v7 }
  0x29   :  { %v121_v24 = vadd.f32 %v396_v35, %v120_v15  ;;  %v127_v25 = vadd.f32 %v400_v39, %v126_v18  ;;  %v167_v26 = vmul.f32 %v396_v35, %v336_v8  ;;  %v168_v27 = vmul.f32 %v400_v39, %v344_v12 }
  0x2a   :  { %282 = vrcp.f32 %v119_v19  ;;  %v133_v28 = vadd.f32 %v402_v43, %v132_v21  ;;  %v169_v29 = vmul.f32 %v402_v43, %v349_v13  ;;  %v188_v30 = vrot.slane %v393_v1, 4 }
  0x2b   :  { %v275_v7 = vpop.eup %274  ;;  %v122_v31 = vrot.slane %v121_v24, 2  ;;  %v128_v32 = vrot.slane %v127_v25, 2  ;;  %v194_v33 = vrot.slane %v166_v22, 4  ;;  %v200_v34 = vrot.slane %v167_v26, 4 }
  0x2c   :  { %v277_v36 = vpop.eup %276  ;;  %v146_v2 = vmul.f32 %v275_v7, %v369_v16  ;;  %v218_v8 = vmul.f32 %v275_v7, %v175_v3  ;;  %v134_v37 = vrot.slane %v133_v28, 2  ;;  %v189_v12 = vadd.f32 %v188_v30, %v393_v1 }
  0x2d   :  { %v279_v38 = vpop.eup %278  ;;  %v147_v40 = vmul.f32 %v277_v36, %v371_v17  ;;  %v219_v41 = vmul.f32 %v277_v36, %v181_v9  ;;  %v123_v42 = vadd.f32 %v122_v31, %v121_v24  ;;  %v129_v13 = vadd.f32 %v128_v32, %v127_v25 }
  0x2e   :  { %v281_v6 = vpop.eup %280  ;;  %154 = vst [vmem:[%s458_s2] sm:$0xff] %v146_v2  ;;  %v148_v44 = vmul.f32 %v279_v38, %v376_v20  ;;  %v220_v45 = vmul.f32 %v279_v38, %v187_v14  ;;  %v135_v46 = vadd.f32 %v134_v37, %v133_v28  ;;  %v190_v16 = vrot.slane %v189_v12, 2 }
  0x2f   :  { %155 = vst [vmem:[%s458_s2 + $0x8] sm:$0xff] %v147_v40  ;;  %v149_v1 = vmul.f32 %v281_v6, %v381_v23  ;;  %v124_v17 = vrot.slane %v123_v42, 1  ;;  %v130_v47 = vrot.slane %v129_v13, 1  ;;  %v195_v48 = vadd.f32 %v194_v33, %v166_v22 }
  0x30   :  { %v283_v49 = vpop.eup %282  ;;  %156 = vst [vmem:[%s458_s2 + $0x10] sm:$0xff] %v148_v44  ;;  %v136_v50 = vrot.slane %v135_v46, 1  ;;  %v191_v51 = vadd.f32 %v190_v16, %v189_v12  ;;  %v201_v20 = vadd.f32 %v200_v34, %v167_v26  ;;  %v206_v52 = vrot.slane %v168_v27, 4 }
  0x31   :  { %157 = vst [vmem:[%s458_s2 + $0x18] sm:$0xff] %v149_v1  ;;  %v150_v53 = vmul.f32 %v283_v49, %v387_v0  ;;  %v125_v54 = vadd.f32 %v124_v17, %v123_v42  ;;  %v131_v23 = vadd.f32 %v130_v47, %v129_v13  ;;  %v196_v55 = vrot.slane %v195_v48, 2 }
  0x32   :  { %v137_v56 = vadd.f32 %v136_v50, %v135_v46  ;;  %v192_v57 = vrot.slane %v191_v51, 1  ;;  %v202_v58 = vrot.slane %v201_v20, 2  ;;  %v207_v59 = vadd.f32 %v206_v52, %v168_v27 }
  0x33   :  { %158 = vst [vmem:[%s458_s2 + $0x20] sm:$0xff] %v150_v53  ;;  %284 = vrcp.f32 %v125_v54  ;;  %v197_v60 = vadd.f32 %v196_v55, %v195_v48  ;;  %v212_v61 = vrot.slane %v169_v29, 4  ;;  %v235_v62 = vsel %vm234_vm0, %v219_v41, %v218_v8 }
  0x34   :  { %286 = vrcp.f32 %v131_v23  ;;  %v193_v63 = vadd.f32 %v192_v57, %v191_v51  ;;  %v203_v3 = vadd.f32 %v202_v58, %v201_v20  ;;  %v208_v0 = vrot.slane %v207_v59, 2 }
  0x35   :  { %288 = vrcp.f32 %v137_v56  ;;  %v198_v4 = vrot.slane %v197_v60, 1  ;;  %v213_v5 = vadd.f32 %v212_v61, %v169_v29  ;;  %v237_v14 = vsel %vm236_vm1, %v220_v45, %v235_v62 }
  0x36   :  { %v204_v9 = vrot.slane %v203_v3, 1  ;;  %v209_v10 = vadd.f32 %v208_v0, %v207_v59  ;;  %v221_v11 = vmul.f32 %v281_v6, %v193_v63 }
  0x37   :  { %v199_v15 = vadd.f32 %v198_v4, %v197_v60  ;;  %v214_v18 = vrot.slane %v213_v5, 2 }
  0x38   :  { %v205_v19 = vadd.f32 %v204_v9, %v203_v3  ;;  %v210_v21 = vrot.slane %v209_v10, 1  ;;  %v239_v22 = vsel %vm238_vm2, %v221_v11, %v237_v14 }
  0x39   :  { %v285_v24 = vpop.eup %284  ;;  %v215_v25 = vadd.f32 %v214_v18, %v213_v5  ;;  %v222_v26 = vmul.f32 %v283_v49, %v199_v15 }
  0x3a   :  { %v287_v27 = vpop.eup %286  ;;  %v151_v28 = vmul.f32 %v285_v24, %v396_v35  ;;  %v211_v29 = vadd.f32 %v210_v21, %v209_v10  ;;  %v223_v30 = vmul.f32 %v285_v24, %v205_v19 }
  0x3b   :  { %v289_v7 = vpop.eup %288  ;;  %v152_v31 = vmul.f32 %v287_v27, %v400_v39  ;;  %v216_v32 = vrot.slane %v215_v25, 1  ;;  %v241_v33 = vsel %vm240_vm3, %v222_v26, %v239_v22 }
  0x3c   :  { %159 = vst [vmem:[%s458_s2 + $0x28] sm:$0xff] %v151_v28  ;;  %v153_v34 = vmul.f32 %v289_v7, %v402_v43  ;;  %v224_v36 = vmul.f32 %v287_v27, %v211_v29  ;;  %v243_v2 = vsel %vm242_vm4, %v223_v30, %v241_v33 }
  0x3d   :  { %160 = vst [vmem:[%s458_s2 + $0x30] sm:$0xff] %v152_v31  ;;  %v217_v35 = vadd.f32 %v216_v32, %v215_v25 }
  0x3e   :  { %161 = vst [vmem:[%s458_s2 + $0x38] sm:$0xff] %v153_v34  ;;  %v245_v39 = vsel %vm244_vm5, %v224_v36, %v243_v2 }
  0x3f   :  { %v225_v8 = vmul.f32 %v289_v7, %v217_v35 }
  0x41   :  { %v247_v37 = vsel %vm246_vm6, %v225_v8, %v245_v39 }
  0x42   :  { %249 = vst [vmem:[%s459_s1] sm:$0xff] %v247_v37 }

</bundles_post_ra>
